<compile_context>
chip_gen: v6e
topology: v6e:2x2x1
jax: 0.10.0
libtpu: 0.0.40
codegen_flags: <defaults>
</compile_context>

<pallas_src>
import functools

import jax
import jax.numpy as jnp
from jax import lax
from jax.experimental import pallas as pl
from jax.experimental.pallas import tpu as pltpu


def _round_up(v, m):
    return (v + m - 1) // m * m


def _bayes_linear_kernel(x_ref, mu_ref, sigma_ref, eps_ref, b_ref, out_ref, *,
                         mxu_dtype):
    k = pl.program_id(2)            # dim_in (reduction) tile, innermost
    nk = pl.num_programs(2)

    @pl.when(k == 0)
    def _():
        out_ref[...] = jnp.zeros_like(out_ref)

    # ---- sample this (tn, tk) weight tile: w = mu + sigma * eps (f32 VPU) ----
    w = (mu_ref[...].astype(jnp.float32)
         + sigma_ref[...].astype(jnp.float32) * eps_ref[...].astype(jnp.float32))

    x = x_ref[...].astype(mxu_dtype)
    w = w.astype(mxu_dtype)

    # Contract x (tm, tk) with w (tn, tk) along tk -> (tm, tn); no transpose.
    out_ref[...] += lax.dot_general(
        x, w, dimension_numbers=(((1,), (1,)), ((), ())),
        preferred_element_type=jnp.float32)

    @pl.when(k == nk - 1)
    def _():
        # Pre-sampled bias tile (1, tn), broadcast over the tm rows.
        out_ref[...] += b_ref[...].astype(jnp.float32)


def bayesian_linear_blitz_forward(x, weight_mu, weight_rho, bias_mu, bias_rho,
                                  key, *, tm=1024, tn=256, tk=512,
                                  param_dtype=jnp.bfloat16,
                                  mxu_dtype=jnp.bfloat16):
    """y = F.linear(x, mu_w + softplus(rho_w)*eps_w, mu_b + softplus(rho_b)*eps_b)."""
    batch, dim_in = x.shape
    dim_out, _ = weight_mu.shape
    f32 = jnp.float32

    # ---- sample eps in the wrapper (same semantics as torch randn_like per call).
    k_w, k_b = jax.random.split(key)
    eps_w = jax.random.normal(k_w, (dim_out, dim_in), f32)
    eps_b = jax.random.normal(k_b, (dim_out,), f32)

    # Precompute sigma (numerically-stable softplus, matches F.softplus) and the
    # sampled bias (dim_out elements -> negligible) outside the kernel.
    sigma_w = jax.nn.softplus(weight_rho.astype(f32))
    b = bias_mu.astype(f32) + jax.nn.softplus(bias_rho.astype(f32)) * eps_b

    # ---- lane/sublane-dense padded sizes & tile selection ---------------------
    mp = _round_up(batch, 8)
    kp = _round_up(dim_in, 128)
    np_ = _round_up(dim_out, 128)
    tm = min(tm, mp)
    tk = min(tk, kp)
    tn = min(tn, np_)
    # If the batch axis collapses to a single tile, keep >=2 output tiles when
    # possible so v7x's second TensorCore still gets work.
    if tm == mp and np_ >= 256 and np_ // tn < 2:
        tn = 128
    mp = _round_up(mp, tm)
    kp = _round_up(kp, tk)
    np_ = _round_up(np_, tn)

    def pad2(a, rows, cols, dtype):
        a = a.astype(dtype)
        if a.shape == (rows, cols):
            return a                      # skip padding copy when already aligned
        out = jnp.zeros((rows, cols), dtype)
        return out.at[:a.shape[0], :a.shape[1]].set(a)

    xp = pad2(x, mp, kp, x.dtype)
    mu_p = pad2(weight_mu, np_, kp, param_dtype)
    sigma_p = pad2(sigma_w, np_, kp, param_dtype)    # zero-padded -> sigma = 0
    eps_p = pad2(eps_w, np_, kp, param_dtype)
    b_p = pad2(b.reshape(1, dim_out), 1, np_, f32)

    grid = (mp // tm, np_ // tn, kp // tk)
    kernel = functools.partial(_bayes_linear_kernel, mxu_dtype=mxu_dtype)

    out_padded = pl.pallas_call(
        kernel,
        out_shape=jax.ShapeDtypeStruct((mp, np_), jnp.float32),
        grid_spec=pltpu.PrefetchScalarGridSpec(
            num_scalar_prefetch=0,
            grid=grid,
            in_specs=[
                pl.BlockSpec((tm, tk), lambda i, j, k: (i, k)),   # x
                pl.BlockSpec((tn, tk), lambda i, j, k: (j, k)),   # weight_mu
                pl.BlockSpec((tn, tk), lambda i, j, k: (j, k)),   # sigma_w
                pl.BlockSpec((tn, tk), lambda i, j, k: (j, k)),   # eps_w
                pl.BlockSpec((1, tn), lambda i, j, k: (0, j)),    # sampled bias
            ],
            out_specs=pl.BlockSpec((tm, tn), lambda i, j, k: (i, j)),
        ),
        compiler_params=pltpu.CompilerParams(
            dimension_semantics=("parallel", "parallel", "arbitrary"),
            vmem_limit_bytes=48 * 1024 * 1024),
    )(xp, mu_p, sigma_p, eps_p, b_p)

    return out_padded[:batch, :dim_out].astype(x.dtype)


if __name__ == "__main__":
    # Small shapes consistent with the module.
    batch, dim_in, dim_out = 2, 16, 32
    posterior_mu_init, posterior_rho_init = 0.0, -3.0
    # prior_sigma_1 / prior_sigma_2 / prior_pi only affect the KL bookkeeping,
    # which is not part of the returned forward value.

    root = jax.random.PRNGKey(0)
    k_wmu, k_wrho, k_bmu, k_brho, k_x, k_eps = jax.random.split(root, 6)

    weight_mu = posterior_mu_init + 0.1 * jax.random.normal(k_wmu, (dim_out, dim_in), jnp.float32)
    weight_rho = posterior_rho_init + 0.1 * jax.random.normal(k_wrho, (dim_out, dim_in), jnp.float32)
    bias_mu = posterior_mu_init + 0.1 * jax.random.normal(k_bmu, (dim_out,), jnp.float32)
    bias_rho = posterior_rho_init + 0.1 * jax.random.normal(k_brho, (dim_out,), jnp.float32)
    x = jax.random.normal(k_x, (batch, dim_in), jnp.float32)

    y = bayesian_linear_blitz_forward(x, weight_mu, weight_rho, bias_mu, bias_rho,
                                      key=k_eps)
    y = jax.block_until_ready(y)

    assert y.shape == (batch, dim_out), y.shape
    assert y.dtype == jnp.float32
    assert bool(jnp.all(jnp.isfinite(y)))

    # Sanity: with rho ~ -3, sigma ~ 0.05, so y must lie close to the
    # deterministic mean forward x @ mu.T + mu_b.
    y_mean = x @ weight_mu.T + bias_mu
    assert float(jnp.max(jnp.abs(y - y_mean))) < 3.0

    print("KERNEL_OK")
</pallas_src>

<mosaic_0001>
module attributes {stable_mosaic.version = 11 : i64} {
  func.func @_bayes_linear_kernel(%arg0: i32, %arg1: i32, %arg2: i32, %arg3: memref<8x128xf32, #tpu.memory_space<vmem>>, %arg4: memref<128x128xbf16, #tpu.memory_space<vmem>>, %arg5: memref<128x128xbf16, #tpu.memory_space<vmem>>, %arg6: memref<128x128xbf16, #tpu.memory_space<vmem>>, %arg7: memref<1x128xf32, #tpu.memory_space<vmem>>, %arg8: memref<8x128xf32, #tpu.memory_space<vmem>>) attributes {dimension_semantics = [#tpu.dimension_semantics<parallel>, #tpu.dimension_semantics<parallel>, #tpu.dimension_semantics<arbitrary>], iteration_bounds = array<i64: 1, 1, 1>, scalar_prefetch = 0 : i64, scratch_operands = 0 : i64, tpu.core_type = #tpu.core_type<tc>, window_params = [{transform_indices = @transform_0, window_bounds = array<i64: 8, 128>}, {transform_indices = @transform_1, window_bounds = array<i64: 128, 128>}, {transform_indices = @transform_2, window_bounds = array<i64: 128, 128>}, {transform_indices = @transform_3, window_bounds = array<i64: 128, 128>}, {transform_indices = @transform_4, window_bounds = array<i64: 1, 128>}, {transform_indices = @transform_5, window_bounds = array<i64: 8, 128>}]} {
    %c0_i32 = arith.constant 0 : i32
    %0 = arith.cmpi eq, %arg2, %c0_i32 : i32
    %1 = arith.extui %0 : i1 to i32
    %c0_i32_0 = arith.constant 0 : i32
    %2 = arith.cmpi ne, %1, %c0_i32_0 : i32
    scf.if %2 {
      %cst_14 = arith.constant 0.000000e+00 : f32
      %21 = vector.broadcast %cst_14 : f32 to vector<8x128xf32>
      %c0_15 = arith.constant 0 : index
      %c0_16 = arith.constant 0 : index
      %22 = vector.load %arg8[%c0_15, %c0_16] : memref<8x128xf32, #tpu.memory_space<vmem>>, vector<8x128xf32>
      tpu.vector_store %arg8[%c0_15, %c0_16], %21 {strides = array<i32>} : memref<8x128xf32, #tpu.memory_space<vmem>>, vector<8x128xf32>,
    } else {
    }
    %c0 = arith.constant 0 : index
    %c0_1 = arith.constant 0 : index
    %3 = vector.load %arg4[%c0, %c0_1] : memref<128x128xbf16, #tpu.memory_space<vmem>>, vector<128x128xbf16>
    %4 = arith.extf %3 : vector<128x128xbf16> to vector<128x128xf32>
    %c0_2 = arith.constant 0 : index
    %c0_3 = arith.constant 0 : index
    %5 = vector.load %arg5[%c0_2, %c0_3] : memref<128x128xbf16, #tpu.memory_space<vmem>>, vector<128x128xbf16>
    %6 = arith.extf %5 : vector<128x128xbf16> to vector<128x128xf32>
    %c0_4 = arith.constant 0 : index
    %c0_5 = arith.constant 0 : index
    %7 = vector.load %arg6[%c0_4, %c0_5] : memref<128x128xbf16, #tpu.memory_space<vmem>>, vector<128x128xbf16>
    %8 = arith.extf %7 : vector<128x128xbf16> to vector<128x128xf32>
    %9 = arith.mulf %6, %8 : vector<128x128xf32>
    %10 = arith.addf %4, %9 : vector<128x128xf32>
    %c0_6 = arith.constant 0 : index
    %c0_7 = arith.constant 0 : index
    %11 = vector.load %arg3[%c0_6, %c0_7] : memref<8x128xf32, #tpu.memory_space<vmem>>, vector<8x128xf32>
    %12 = arith.truncf %11 : vector<8x128xf32> to vector<8x128xbf16>
    %13 = arith.truncf %10 : vector<128x128xf32> to vector<128x128xbf16>
    %c0_8 = arith.constant 0 : index
    %c0_9 = arith.constant 0 : index
    %14 = vector.load %arg8[%c0_8, %c0_9] : memref<8x128xf32, #tpu.memory_space<vmem>>, vector<8x128xf32>
    %cst = arith.constant dense<0.000000e+00> : vector<8x128xf32>
    %15 = tpu.matmul %12, %13, %cst {dimension_numbers = #tpu.dot_dimension_numbers<[1], [1], [0], [0], [0, 0, 1, 0], [], []>} : vector<8x128xbf16>, vector<128x128xbf16>, vector<8x128xf32> -> vector<8x128xf32>
    %16 = arith.addf %14, %15 : vector<8x128xf32>
    %c0_10 = arith.constant 0 : index
    %c0_11 = arith.constant 0 : index
    %17 = vector.load %arg8[%c0_10, %c0_11] : memref<8x128xf32, #tpu.memory_space<vmem>>, vector<8x128xf32>
    tpu.vector_store %arg8[%c0_10, %c0_11], %16 {strides = array<i32>} : memref<8x128xf32, #tpu.memory_space<vmem>>, vector<8x128xf32>,
    %c0_i32_12 = arith.constant 0 : i32
    %18 = arith.cmpi eq, %arg2, %c0_i32_12 : i32
    %19 = arith.extui %18 : i1 to i32
    %c0_i32_13 = arith.constant 0 : i32
    %20 = arith.cmpi ne, %19, %c0_i32_13 : i32
    scf.if %20 {
      %c0_14 = arith.constant 0 : index
      %c0_15 = arith.constant 0 : index
      %21 = vector.load %arg8[%c0_14, %c0_15] : memref<8x128xf32, #tpu.memory_space<vmem>>, vector<8x128xf32>
      %c0_16 = arith.constant 0 : index
      %c0_17 = arith.constant 0 : index
      %22 = vector.load %arg7[%c0_16, %c0_17] : memref<1x128xf32, #tpu.memory_space<vmem>>, vector<1x128xf32>
      %23 = vector.broadcast %22 : vector<1x128xf32> to vector<8x128xf32>
      %24 = arith.addf %21, %23 : vector<8x128xf32>
      %c0_18 = arith.constant 0 : index
      %c0_19 = arith.constant 0 : index
      %25 = vector.load %arg8[%c0_18, %c0_19] : memref<8x128xf32, #tpu.memory_space<vmem>>, vector<8x128xf32>
      tpu.vector_store %arg8[%c0_18, %c0_19], %24 {strides = array<i32>} : memref<8x128xf32, #tpu.memory_space<vmem>>, vector<8x128xf32>,
    } else {
    }
    return
  }
  func.func @transform_0(%arg0: i32, %arg1: i32, %arg2: i32) -> (i32, i32) {
    %c0_i32 = arith.constant 0 : i32
    return %arg0, %arg2 : i32, i32
  }
  func.func @transform_1(%arg0: i32, %arg1: i32, %arg2: i32) -> (i32, i32) {
    %c0_i32 = arith.constant 0 : i32
    return %arg1, %arg2 : i32, i32
  }
  func.func @transform_2(%arg0: i32, %arg1: i32, %arg2: i32) -> (i32, i32) {
    %c0_i32 = arith.constant 0 : i32
    return %arg1, %arg2 : i32, i32
  }
  func.func @transform_3(%arg0: i32, %arg1: i32, %arg2: i32) -> (i32, i32) {
    %c0_i32 = arith.constant 0 : i32
    return %arg1, %arg2 : i32, i32
  }
  func.func @transform_4(%arg0: i32, %arg1: i32, %arg2: i32) -> (i32, i32) {
    %c0_i32 = arith.constant 0 : i32
    %c0_i32_0 = arith.constant 0 : i32
    return %c0_i32, %arg1 : i32, i32
  }
  func.func @transform_5(%arg0: i32, %arg1: i32, %arg2: i32) -> (i32, i32) {
    %c0_i32 = arith.constant 0 : i32
    return %arg0, %arg1 : i32, i32
  }
}

</mosaic_0001>

<bundles_post_ra>
// kernel: tpu_custom_call.1
= control target key start
LH: loop header
LB: loop body
LE: loop exit
PB: predicated region body
PF: predicated region fallthrough
CT: control target
= control target key end

     0   :  { %10 = vsyncpa [#allocation3], 0  ;;  %s630_s0 = inlined_call_operand.hbm [shape: f32[8,128], index: 0, kind: input, shape index: {}]   ;;  %s631_s1 = inlined_call_operand.hbm [shape: bf16[128,128], index: 1, kind: input, shape index: {}]   ;;  %s632_s2 = inlined_call_operand.hbm [shape: bf16[128,128], index: 2, kind: input, shape index: {}]   ;;  %s633_s3 = inlined_call_operand.hbm [shape: bf16[128,128], index: 3, kind: input, shape index: {}]   ;;  %s634_s4 = inlined_call_operand.vmem [shape: f32[1,128], index: 4, kind: input, shape index: {}]   ;;  %s635_s5 = inlined_call_operand.hbm [shape: f32[8,128], index: 5, kind: output, shape index: {}]  }
   0x1   :  { %11 = vsyncpa [#allocation6], 0 }
   0x2   :  { %12 = vsyncpa [#allocation9], 0 }
   0x3   :  { %13 = vsyncpa [#allocation4], 0  ;;  %s555_s18 = smov [#allocation5]  }
   0x4   :  { %s29_s19 = sshll.u32 %s555_s18, 4  ;;  %s30_s19 = int_to_ptr.vmem [resolvable:$true] %s29_s19 }
   0x5   :  { %s455_s20 = scalar_lea.vmem %s30_s19, 1024  ;;  %p460_p1 = scmp.lt.s32.totalorder %s30_s19, %s30_s19 }
   0x6   :  { %p456_p0 = scmp.ne.s32.totalorder %s30_s19, %s455_s20  ;;  %p461_p2 = scmp.lt.s32.totalorder %s455_s20, %s455_s20 }
   0x8   :  { %p462_p3 = por %p461_p2, %p460_p1 }
   0xa   :  { %p463_p4 = pnand %p462_p3, %p456_p0 }
   0xc   :  { %466 = shalt.err (!%p463_p4)
}
   0xd   :  { %s556_s21 = smov 64   ;;  %s557_s22 = smov 4  }
   0xe   :  { %35 = dma.hbm_to_vmem [thread:$0]  %s631_s1, 1024, %s30_s19, [#allocation6], %s556_s21, %s556_s21, %s557_s22  }
   0xf   :  { %s558_s25 = smov [#allocation2]   ;;  %s559_s27 = smov [#allocation7]  }
  0x10   :  { %s20_s26 = sshll.u32 %s558_s25, 4  ;;  %s41_s28 = sshll.u32 %s559_s27, 4  ;;  %s21_s26 = int_to_ptr.vmem [resolvable:$true] %s20_s26  ;;  %s42_s28 = int_to_ptr.vmem [resolvable:$true] %s41_s28 }
  0x11   :  { %s475_s29 = scalar_lea.vmem %s21_s26, 128  ;;  %p480_p6 = scmp.lt.s32.totalorder %s21_s26, %s21_s26 }
  0x12   :  { %p476_p5 = scmp.ne.s32.totalorder %s21_s26, %s475_s29  ;;  %p481_p7 = scmp.lt.s32.totalorder %s475_s29, %s475_s29 }
  0x14   :  { %p482_p8 = por %p481_p7, %p480_p6 }
  0x16   :  { %p483_p9 = pnand %p482_p8, %p476_p5 }
  0x18   :  { %486 = shalt.err (!%p483_p9)
}
  0x19   :  { %23 = dma.hbm_to_vmem [thread:$0]  %s630_s0, 128, %s21_s26, [#allocation3]  }
  0x1a   :  { %s495_s7 = scalar_lea.vmem %s42_s28, 1024  ;;  %p500_p11 = scmp.lt.s32.totalorder %s42_s28, %s42_s28 }
  0x1b   :  { %p496_p10 = scmp.ne.s32.totalorder %s42_s28, %s495_s7  ;;  %p501_p12 = scmp.lt.s32.totalorder %s495_s7, %s495_s7 }
  0x1d   :  { %p502_p13 = por %p501_p12, %p500_p11 }
  0x1f   :  { %p503_p0 = pnand %p502_p13, %p496_p10 }
  0x21   :  { %506 = shalt.err (!%p503_p0)
}
  0x22   :  { %47 = dma.hbm_to_vmem [thread:$0]  %s632_s2, 1024, %s42_s28, [#allocation6], %s556_s21, %s556_s21, %s557_s22  }
  0x23   :  { %s560_s9 = smov [#allocation8]  }
  0x24   :  { %s53_s10 = sshll.u32 %s560_s9, 4  ;;  %s54_s10 = int_to_ptr.vmem [resolvable:$true] %s53_s10 }
  0x25   :  { %s515_s11 = scalar_lea.vmem %s54_s10, 1024  ;;  %p520_p2 = scmp.lt.s32.totalorder %s54_s10, %s54_s10 }
  0x26   :  { %p516_p1 = scmp.ne.s32.totalorder %s54_s10, %s515_s11  ;;  %p521_p3 = scmp.lt.s32.totalorder %s515_s11, %s515_s11 }
  0x28   :  { %p522_p4 = por %p521_p3, %p520_p2 }
  0x2a   :  { %p523_p5 = pnand %p522_p4, %p516_p1 }
  0x2c   :  { %526 = shalt.err (!%p523_p5)
}
  0x2d   :  { %59 = dma.hbm_to_vmem [thread:$0]  %s633_s3, 1024, %s54_s10, [#allocation9], %s556_s21, %s556_s21, %s557_s22  }
  0x2e   :  { %547 = dma.done.wait [#allocation3], 128  }
  0x2f   :  { %548 = vsyncadd [#allocation3], 4294967168 }
  0x30   :  { %549 = dma.done.wait [#allocation6], 2048  }
  0x31   :  { %550 = vsyncadd [#allocation6], 4294965248 }
  0x32   :  { %551 = dma.done.wait [#allocation9], 1024  }
  0x33   :  { %552 = vsyncadd [#allocation9], 4294966272  ;;  %v561_v0 = vmov 0.0   ;;  %vm562_vm0 = vmmov 0   ;;  %v394_v1 = vld [vmem:[#allocation5 + $0x38] sm:$0xff]   ;;  %v400_v6 = vld [vmem:[#allocation7 + $0x30] sm:$0xff]  }
  0x34   :  { %418 = vmatprep.subr.bf16.mxu0 %v561_v0  ;;  %434 = vmatprep.mubr.msk.bf16.mxu0 %vm562_vm0, %v561_v0  ;;  %v401_v2 = vld [vmem:[#allocation7 + $0x38] sm:$0xff]   ;;  %v407_v7 = vld [vmem:[#allocation8 + $0x30] sm:$0xff]   ;;  %v322_v8 = vunpack.c.l.bf16 %v394_v1  ;;  %v323_v9 = vunpack.c.h.bf16 %v394_v1  ;;  %v350_v13 = vunpack.c.l.bf16 %v400_v6  ;;  %v351_v14 = vunpack.c.h.bf16 %v400_v6  ;;  %v399_v25 = vld [vmem:[#allocation7 + $0x28] sm:$0xff]   ;;  %s563_s13 = smov [#allocation10]  }
  0x35   :  { %v408_v3 = vld [vmem:[#allocation8 + $0x38] sm:$0xff]   ;;  %v354_v4 = vunpack.c.l.bf16 %v401_v2  ;;  %v355_v5 = vunpack.c.h.bf16 %v401_v2  ;;  %v393_v12 = vld [vmem:[#allocation5 + $0x30] sm:$0xff]   ;;  %v382_v15 = vunpack.c.l.bf16 %v407_v7  ;;  %v383_v16 = vunpack.c.h.bf16 %v407_v7  ;;  %v406_v26 = vld [vmem:[#allocation8 + $0x28] sm:$0xff]   ;;  %s280_s14 = sshll.u32 %s563_s13, 4  ;;  %s281_s14 = int_to_ptr.vmem [resolvable:$true] %s280_s14 }
  0x36   :  { %v386_v10 = vunpack.c.l.bf16 %v408_v3  ;;  %v387_v11 = vunpack.c.h.bf16 %v408_v3  ;;  %v318_v19 = vunpack.c.l.bf16 %v393_v12  ;;  %v319_v20 = vunpack.c.h.bf16 %v393_v12  ;;  %v392_v32 = vld [vmem:[#allocation5 + $0x28] sm:$0xff]   ;;  %v398_v40 = vld [vmem:[#allocation7 + $0x20] sm:$0xff]   ;;  %v397_v54 = vld [vmem:[#allocation7 + $0x18] sm:$0xff]   ;;  %s527_s15 = scalar_lea.vmem %s281_s14, 128  ;;  %p532_p7 = scmp.lt.s32.totalorder %s281_s14, %s281_s14 }
  0x37   :  { %v188_v23 = vmul.f32 %v382_v15, %v350_v13  ;;  %v189_v24 = vmul.f32 %v383_v16, %v351_v14  ;;  %v346_v28 = vunpack.c.l.bf16 %v399_v25  ;;  %v347_v29 = vunpack.c.h.bf16 %v399_v25  ;;  %v405_v41 = vld [vmem:[#allocation8 + $0x20] sm:$0xff]   ;;  %v404_v55 = vld [vmem:[#allocation8 + $0x18] sm:$0xff]   ;;  %v403_v6 = vld [vmem:[#allocation8 + $0x10] sm:$0xff]   ;;  %p528_p6 = scmp.ne.s32.totalorder %s281_s14, %s527_s15  ;;  %p533_p8 = scmp.lt.s32.totalorder %s527_s15, %s527_s15 }
  0x38   :  { %v190_v17 = vmul.f32 %v386_v10, %v354_v4  ;;  %v191_v18 = vmul.f32 %v387_v11, %v355_v5  ;;  %v378_v33 = vunpack.c.l.bf16 %v406_v26  ;;  %v379_v34 = vunpack.c.h.bf16 %v406_v26  ;;  %v391_v46 = vld [vmem:[#allocation5 + $0x20] sm:$0xff]   ;;  %v390_v60 = vld [vmem:[#allocation5 + $0x18] sm:$0xff]   ;;  %v396_v5 = vld [vmem:[#allocation7 + $0x10] sm:$0xff]  }
  0x39   :  { %v204_v30 = vadd.f32 %v318_v19, %v188_v23  ;;  %v205_v31 = vadd.f32 %v319_v20, %v189_v24  ;;  %v314_v35 = vunpack.c.l.bf16 %v392_v32  ;;  %v315_v37 = vunpack.c.h.bf16 %v392_v32  ;;  %v389_v11 = vld [vmem:[#allocation5 + $0x10] sm:$0xff]   ;;  %v395_v19 = vld [vmem:[#allocation7 + $0x8] sm:$0xff]   ;;  %p534_p9 = por %p533_p8, %p532_p7 }
  0x3a   :  { %v206_v21 = vadd.f32 %v322_v8, %v190_v17  ;;  %v207_v22 = vadd.f32 %v323_v9, %v191_v18  ;;  %v186_v38 = vmul.f32 %v378_v33, %v346_v28  ;;  %v187_v39 = vmul.f32 %v379_v34, %v347_v29  ;;  %v402_v20 = vld [vmem:[#allocation8 + $0x8] sm:$0xff]   ;;  %v325_v33 = vld [vmem:[#allocation7] sm:$0xff]  }
  0x3b   :  { %v216_v36 = vpack.c.bf16 %v205_v31, %v204_v30  ;;  %v342_v42 = vunpack.c.l.bf16 %v398_v40  ;;  %v343_v43 = vunpack.c.h.bf16 %v398_v40  ;;  %v374_v47 = vunpack.c.l.bf16 %v405_v41  ;;  %v388_v25 = vld [vmem:[#allocation5 + $0x8] sm:$0xff]   ;;  %v357_v34 = vld [vmem:[#allocation8] sm:$0xff]   ;;  %p535_p10 = pnand %p534_p9, %p528_p6 }
  0x3c   :  { %v217_v27 = vpack.c.bf16 %v207_v22, %v206_v21  ;;  %v202_v44 = vadd.f32 %v314_v35, %v186_v38  ;;  %v203_v45 = vadd.f32 %v315_v37, %v187_v39  ;;  %v375_v48 = vunpack.c.h.bf16 %v405_v41  ;;  %v293_v39 = vld [vmem:[#allocation5] sm:$0xff]  }
  0x3d   :  { %v310_v49 = vunpack.c.l.bf16 %v391_v46  ;;  %v311_v51 = vunpack.c.h.bf16 %v391_v46  ;;  %v184_v52 = vmul.f32 %v374_v47, %v342_v42  ;;  %v338_v56 = vunpack.c.l.bf16 %v397_v54 }
  0x3e   :  { %419 = vmatpush3.bf16.xpose.msra.mxu0 %v217_v27  ;;  %v215_v50 = vpack.c.bf16 %v203_v45, %v202_v44  ;;  %v185_v53 = vmul.f32 %v375_v48, %v343_v43  ;;  %v339_v57 = vunpack.c.h.bf16 %v397_v54  ;;  %v370_v61 = vunpack.c.l.bf16 %v404_v55 }
  0x3f   :  { %420 = vmatprep.subr.bf16.mxu0 %v561_v0  ;;  %v200_v58 = vadd.f32 %v310_v49, %v184_v52  ;;  %v371_v62 = vunpack.c.h.bf16 %v404_v55  ;;  %v306_v63 = vunpack.c.l.bf16 %v390_v60  ;;  %v307_v2 = vunpack.c.h.bf16 %v390_v60 }
  0x40   :  { %v201_v59 = vadd.f32 %v311_v51, %v185_v53  ;;  %v182_v3 = vmul.f32 %v370_v61, %v338_v56  ;;  %v334_v7 = vunpack.c.l.bf16 %v396_v5  ;;  %v335_v8 = vunpack.c.h.bf16 %v396_v5  ;;  %v291_v53 = vld [vmem:[%s634_s4] ss:$0 sm:$0xff] }
  0x41   :  { %v183_v4 = vmul.f32 %v371_v62, %v339_v57  ;;  %v366_v12 = vunpack.c.l.bf16 %v403_v6  ;;  %v367_v13 = vunpack.c.h.bf16 %v403_v6  ;;  %v302_v14 = vunpack.c.l.bf16 %v389_v11 }
  0x42   :  { %v214_v1 = vpack.c.bf16 %v201_v59, %v200_v58  ;;  %v198_v9 = vadd.f32 %v306_v63, %v182_v3  ;;  %v303_v16 = vunpack.c.h.bf16 %v389_v11  ;;  %v330_v21 = vunpack.c.l.bf16 %v395_v19 }
  0x43   :  { %v199_v10 = vadd.f32 %v307_v2, %v183_v4  ;;  %v180_v17 = vmul.f32 %v366_v12, %v334_v7  ;;  %v181_v18 = vmul.f32 %v367_v13, %v335_v8  ;;  %v331_v22 = vunpack.c.h.bf16 %v395_v19 }
  0x44   :  { %v362_v26 = vunpack.c.l.bf16 %v402_v20  ;;  %v363_v27 = vunpack.c.h.bf16 %v402_v20  ;;  %v298_v28 = vunpack.c.l.bf16 %v388_v25  ;;  %v299_v30 = vunpack.c.h.bf16 %v388_v25 }
  0x45   :  { %v213_v15 = vpack.c.bf16 %v199_v10, %v198_v9  ;;  %v196_v23 = vadd.f32 %v302_v14, %v180_v17  ;;  %v197_v24 = vadd.f32 %v303_v16, %v181_v18  ;;  %v326_v35 = vunpack.c.l.bf16 %v325_v33 }
  0x46   :  { %421 = vmatpush3.bf16.xpose.msra.mxu0 %v216_v36  ;;  %v178_v31 = vmul.f32 %v362_v26, %v330_v21  ;;  %v179_v32 = vmul.f32 %v363_v27, %v331_v22  ;;  %v327_v36 = vunpack.c.h.bf16 %v325_v33  ;;  %v358_v40 = vunpack.c.l.bf16 %v357_v34 }
  0x47   :  { %422 = vmatprep.subr.bf16.mxu0 %v561_v0  ;;  %v212_v29 = vpack.c.bf16 %v197_v24, %v196_v23  ;;  %v359_v41 = vunpack.c.h.bf16 %v357_v34  ;;  %v294_v42 = vunpack.c.l.bf16 %v293_v39  ;;  %v295_v44 = vunpack.c.h.bf16 %v293_v39 }
  0x48   :  { %v194_v37 = vadd.f32 %v298_v28, %v178_v31  ;;  %v195_v38 = vadd.f32 %v299_v30, %v179_v32  ;;  %v176_v45 = vmul.f32 %v358_v40, %v326_v35 }
  0x49   :  { %v177_v46 = vmul.f32 %v359_v41, %v327_v36 }
  0x4a   :  { %v211_v43 = vpack.c.bf16 %v195_v38, %v194_v37  ;;  %v192_v47 = vadd.f32 %v294_v42, %v176_v45 }
  0x4b   :  { %v193_v48 = vadd.f32 %v295_v44, %v177_v46 }
  0x4d   :  { %v210_v49 = vpack.c.bf16 %v193_v48, %v192_v47 }
  0x4e   :  { %423 = vmatpush3.bf16.xpose.msra.mxu0 %v215_v50  ;;  %v208_v50 = vld [vmem:[#allocation2] sm:$0xff] }
  0x4f   :  { %424 = vmatprep.subr.bf16.mxu0 %v561_v0  ;;  %v209_v51 = vpack.c.bf16 %v208_v50, %v208_v50 }
  0x56   :  { %425 = vmatpush3.bf16.xpose.msra.mxu0 %v214_v1 }
  0x57   :  { %426 = vmatprep.subr.bf16.mxu0 %v561_v0 }
  0x5e   :  { %427 = vmatpush3.bf16.xpose.msra.mxu0 %v213_v15 }
  0x5f   :  { %428 = vmatprep.subr.bf16.mxu0 %v561_v0 }
  0x66   :  { %429 = vmatpush3.bf16.xpose.msra.mxu0 %v212_v29 }
  0x67   :  { %430 = vmatprep.subr.bf16.mxu0 %v561_v0 }
  0x6e   :  { %431 = vmatpush3.bf16.xpose.msra.mxu0 %v211_v43 }
  0x6f   :  { %432 = vmatprep.subr.bf16.mxu0 %v561_v0 }
  0x76   :  { %433 = vmatpush3.bf16.xpose.msra.mxu0 %v210_v49 }
  0x7d   :  { %435 = vmatmul.mubr.bf16.vlgmr.msra.gmra.mxu0 %v209_v51 }
 0x13d   :  { %v253_v52 = vpop.f32.mrf.mxu0 }
 0x13e   :  { %v272_v55 = vadd.f32 %v291_v53, %v253_v52 }
 0x13f   :  { %v436_v54 = vpop.f32.mrf.mxu0 }
 0x140   :  { %273 = vst [vmem:[#allocation10] sm:$0xff] %v272_v55 }
 0x141   :  { %v256_v56 = vpop.f32.mrf.mxu0 }
 0x143   :  { %v437_v57 = vpop.f32.mrf.mxu0 }
 0x144   :  { %538 = shalt.err (!%p535_p10)
}
 0x145   :  { %283 = dma.vmem_to_hbm [thread:$0]  %s281_s14, 128, %s635_s5, [#allocation4]  }
 0x146   :  { %553 = dma.done.wait [#allocation4], 128  }
 0x147   :  { %554 = vsyncadd [#allocation4], 4294967168 }
 0x148   :  { %287 = vsyncpa [#allocation3], 1 }
 0x149   :  { %288 = vsyncpa [#allocation6], 1 }
 0x14a   :  { %289 = vsyncpa [#allocation9], 1 }
 0x14b   :  { %290 = vsyncpa [#allocation4], 1 }

</bundles_post_ra>
